<compile_context>
chip_gen: v7x
topology: tpu7x:2x2x1
jax: 0.10.0
libtpu: 0.0.40
codegen_flags: <defaults>
</compile_context>

<pallas_src>
import functools

import jax
import jax.numpy as jnp
from jax.experimental import pallas as pl
from jax.experimental.pallas import tpu as pltpu

LANE = 128          # TPU vreg lane width
MAX_BATCH_TILE = 512  # rows per grid step (>=512 already ~85% of HBM roofline)


def _round_up(n, m):
    return ((n + m - 1) // m) * m


def mlp_kernel(x_ref, w1_ref, b1_ref, w2_ref, b2_ref, o_ref):
    """One batch tile of: ReLU(x @ W1^T + b1) @ W2^T + b2 (dropout = identity)."""
    # Layer 1. Weights arrive pre-transposed / pre-padded / pre-cast; cast the
    # activations to the weight (MXU) dtype right before the dot only.
    mxu_dtype = w1_ref.dtype
    h = jnp.dot(x_ref[...].astype(mxu_dtype), w1_ref[...],
                preferred_element_type=jnp.float32)
    # Bias + ReLU on the f32 accumulator (full 128-lane VPU ops, H padded).
    h = jnp.maximum(h + b1_ref[...], 0.0)

    # Dropout: identity (eval-mode semantics).
    # TODO(synk): training-mode dropout (prng mask + 1/(1-p) rescale).

    # Layer 2 (K = padded hidden = 128, lane-dense output).
    out = jnp.dot(h.astype(w2_ref.dtype), w2_ref[...],
                  preferred_element_type=jnp.float32) + b2_ref[...]

    # d_out padded to 128 => full-width unmasked store.
    o_ref[...] = out.astype(o_ref.dtype)


def prepare_params(w1, b1, w2, b2, *, mxu_dtype=None):
    """One-time parameter prep (hoisted OUT of the per-call forward).

    PyTorch layouts in:  w1 (H, D_in), b1 (H,), w2 (D_out, H), b2 (D_out,).
    Out: transposed, hidden- and lane-padded, optionally pre-cast weights:
      w1_t (D_in, H_pad), b1 (1, H_pad) f32, w2_t (H_pad, D_out_pad),
      b2 (1, D_out_pad) f32.
    """
    H, _ = w1.shape
    D_out = w2.shape[0]
    h_pad = _round_up(H, LANE)
    d_out_pad = _round_up(D_out, LANE)

    w1_t = jnp.pad(jnp.transpose(w1), ((0, 0), (0, h_pad - H)))
    b1_2d = jnp.pad(b1.reshape(1, H), ((0, 0), (0, h_pad - H)))
    w2_t = jnp.pad(jnp.transpose(w2),
                   ((0, h_pad - H), (0, d_out_pad - D_out)))
    b2_2d = jnp.pad(b2.reshape(1, D_out), ((0, 0), (0, d_out_pad - D_out)))

    if mxu_dtype is not None:
        # Pre-cast static weights once (halves weight DMA bytes / VMEM on the
        # bf16 path). Biases stay f32: they add onto the f32 accumulator.
        # TODO(synk): fp8 weights would double peak MXU rate on v7x.
        w1_t = w1_t.astype(mxu_dtype)
        w2_t = w2_t.astype(mxu_dtype)

    return (w1_t, b1_2d, w2_t, b2_2d)


@functools.partial(jax.jit, static_argnames=("d_out",))
def simple_nn_forward(x, params, *, d_out):
    """x: (B, D_in). params: output of prepare_params. Returns (B, d_out)."""
    w1_t, b1_2d, w2_t, b2_2d = params
    B, d_in = x.shape
    h_pad = w1_t.shape[1]
    d_out_pad = w2_t.shape[1]

    # Batch tile: whole batch while small, otherwise 512-row tiles (multiple of
    # the 8-row sublane; keeps per-step VMEM well under v7x's 64 MiB).
    tb = B if B <= MAX_BATCH_TILE else MAX_BATCH_TILE
    grid = (pl.cdiv(B, tb),)

    out_pad = pl.pallas_call(
        mlp_kernel,
        out_shape=jax.ShapeDtypeStruct((B, d_out_pad), x.dtype),
        grid=grid,
        in_specs=[
            # x tiled over batch rows.
            pl.BlockSpec((tb, d_in), lambda i: (i, 0)),
            # Weights / biases: constant index_map -> VMEM-resident whole blocks.
            pl.BlockSpec((d_in, h_pad), lambda i: (0, 0)),
            pl.BlockSpec((1, h_pad), lambda i: (0, 0)),
            pl.BlockSpec((h_pad, d_out_pad), lambda i: (0, 0)),
            pl.BlockSpec((1, d_out_pad), lambda i: (0, 0)),
        ],
        out_specs=pl.BlockSpec((tb, d_out_pad), lambda i: (i, 0)),
        compiler_params=pltpu.CompilerParams(
            dimension_semantics=("parallel",)),  # megacore-shard the batch axis
    )(x, w1_t, b1_2d, w2_t, b2_2d)

    # Drop the lane padding; fused into the same executable by jit.
    return out_pad[:, :d_out]


if __name__ == "__main__":
    # Module hyperparameters (small, consistent with the forward pass).
    # NOTE: real throughput wants batch >= 128 per call (MXU row occupancy);
    # kept small here for the deterministic demo.
    batch, input_dim, hidden_dim, output_dim = 8, 32, 64, 16
    dropout_rate = 0.5  # eval-mode => identity; value unused.

    key = jax.random.PRNGKey(0)
    kx, kw1, kb1, kw2, kb2 = jax.random.split(key, 5)

    x = jax.random.normal(kx, (batch, input_dim), dtype=jnp.float32)
    # PyTorch Linear layouts: W1 (hidden, in), W2 (out, hidden).
    w1 = jax.random.normal(kw1, (hidden_dim, input_dim), dtype=jnp.float32) * 0.1
    b1 = jax.random.normal(kb1, (hidden_dim,), dtype=jnp.float32) * 0.1
    w2 = jax.random.normal(kw2, (output_dim, hidden_dim), dtype=jnp.float32) * 0.1
    b2 = jax.random.normal(kb2, (output_dim,), dtype=jnp.float32) * 0.1

    # Reference in plain JAX (eval-mode dropout == identity).
    ref = jnp.maximum(x @ w1.T + b1, 0.0) @ w2.T + b2

    # --- f32 MXU path (default; numerics match the f32 module) ---
    params_f32 = prepare_params(w1, b1, w2, b2)
    out = jax.block_until_ready(simple_nn_forward(x, params_f32, d_out=output_dim))
    assert out.shape == (batch, output_dim)
    assert jnp.allclose(out, ref, atol=1e-5, rtol=1e-5)

    # --- bf16 MXU path (weights pre-cast once; fast path on v5e/v6e/v7x) ---
    params_bf16 = prepare_params(w1, b1, w2, b2, mxu_dtype=jnp.bfloat16)
    out_bf16 = jax.block_until_ready(
        simple_nn_forward(x, params_bf16, d_out=output_dim))
    assert jnp.allclose(out_bf16, ref, atol=5e-2, rtol=5e-2)

    print("KERNEL_OK")
</pallas_src>

<mosaic_0001>
module attributes {stable_mosaic.version = 11 : i64} {
  func.func @mlp_kernel(%arg0: i32, %arg1: memref<8x32xf32, #tpu.memory_space<vmem>>, %arg2: memref<32x128xf32, #tpu.memory_space<vmem>>, %arg3: memref<1x128xf32, #tpu.memory_space<vmem>>, %arg4: memref<128x128xf32, #tpu.memory_space<vmem>>, %arg5: memref<1x128xf32, #tpu.memory_space<vmem>>, %arg6: memref<8x128xf32, #tpu.memory_space<vmem>>) attributes {dimension_semantics = [#tpu.dimension_semantics<parallel>], iteration_bounds = array<i64: 1>, scalar_prefetch = 0 : i64, scratch_operands = 0 : i64, tpu.core_type = #tpu.core_type<tc>, window_params = [{transform_indices = @transform_0, window_bounds = array<i64: 8, 32>}, {pipeline_mode = #tpu.pipeline_mode<synchronous>, transform_indices = @transform_1, window_bounds = array<i64: 32, 128>}, {pipeline_mode = #tpu.pipeline_mode<synchronous>, transform_indices = @transform_2, window_bounds = array<i64: 1, 128>}, {pipeline_mode = #tpu.pipeline_mode<synchronous>, transform_indices = @transform_3, window_bounds = array<i64: 128, 128>}, {pipeline_mode = #tpu.pipeline_mode<synchronous>, transform_indices = @transform_4, window_bounds = array<i64: 1, 128>}, {transform_indices = @transform_5, window_bounds = array<i64: 8, 128>}]} {
    %c0 = arith.constant 0 : index
    %c0_0 = arith.constant 0 : index
    %0 = vector.load %arg1[%c0, %c0_0] : memref<8x32xf32, #tpu.memory_space<vmem>>, vector<8x32xf32>
    %c0_1 = arith.constant 0 : index
    %c0_2 = arith.constant 0 : index
    %1 = vector.load %arg2[%c0_1, %c0_2] : memref<32x128xf32, #tpu.memory_space<vmem>>, vector<32x128xf32>
    %cst = arith.constant dense<0.000000e+00> : vector<8x128xf32>
    %2 = tpu.matmul %0, %1, %cst {dimension_numbers = #tpu.dot_dimension_numbers<[1], [0], [0], [1], [0, 0, 1, 1], [], []>} : vector<8x32xf32>, vector<32x128xf32>, vector<8x128xf32> -> vector<8x128xf32>
    %c0_3 = arith.constant 0 : index
    %c0_4 = arith.constant 0 : index
    %3 = vector.load %arg3[%c0_3, %c0_4] : memref<1x128xf32, #tpu.memory_space<vmem>>, vector<1x128xf32>
    %4 = vector.broadcast %3 : vector<1x128xf32> to vector<8x128xf32>
    %5 = arith.addf %2, %4 : vector<8x128xf32>
    %cst_5 = arith.constant 0.000000e+00 : f32
    %6 = vector.broadcast %cst_5 : f32 to vector<8x128xf32>
    %7 = arith.maximumf %5, %6 : vector<8x128xf32>
    %c0_6 = arith.constant 0 : index
    %c0_7 = arith.constant 0 : index
    %8 = vector.load %arg4[%c0_6, %c0_7] : memref<128x128xf32, #tpu.memory_space<vmem>>, vector<128x128xf32>
    %cst_8 = arith.constant dense<0.000000e+00> : vector<8x128xf32>
    %9 = tpu.matmul %7, %8, %cst_8 {dimension_numbers = #tpu.dot_dimension_numbers<[1], [0], [0], [1], [0, 0, 1, 1], [], []>} : vector<8x128xf32>, vector<128x128xf32>, vector<8x128xf32> -> vector<8x128xf32>
    %c0_9 = arith.constant 0 : index
    %c0_10 = arith.constant 0 : index
    %10 = vector.load %arg5[%c0_9, %c0_10] : memref<1x128xf32, #tpu.memory_space<vmem>>, vector<1x128xf32>
    %11 = vector.broadcast %10 : vector<1x128xf32> to vector<8x128xf32>
    %12 = arith.addf %9, %11 : vector<8x128xf32>
    %c0_11 = arith.constant 0 : index
    %c0_12 = arith.constant 0 : index
    %13 = vector.load %arg6[%c0_11, %c0_12] : memref<8x128xf32, #tpu.memory_space<vmem>>, vector<8x128xf32>
    tpu.vector_store %arg6[%c0_11, %c0_12], %12 {strides = array<i32>} : memref<8x128xf32, #tpu.memory_space<vmem>>, vector<8x128xf32>,
    return
  }
  func.func @transform_0(%arg0: i32) -> (i32, i32) {
    %c0_i32 = arith.constant 0 : i32
    %c0_i32_0 = arith.constant 0 : i32
    return %arg0, %c0_i32 : i32, i32
  }
  func.func @transform_1(%arg0: i32) -> (i32, i32) {
    %c0_i32 = arith.constant 0 : i32
    %c0_i32_0 = arith.constant 0 : i32
    %c0_i32_1 = arith.constant 0 : i32
    return %c0_i32, %c0_i32_0 : i32, i32
  }
  func.func @transform_2(%arg0: i32) -> (i32, i32) {
    %c0_i32 = arith.constant 0 : i32
    %c0_i32_0 = arith.constant 0 : i32
    %c0_i32_1 = arith.constant 0 : i32
    return %c0_i32, %c0_i32_0 : i32, i32
  }
  func.func @transform_3(%arg0: i32) -> (i32, i32) {
    %c0_i32 = arith.constant 0 : i32
    %c0_i32_0 = arith.constant 0 : i32
    %c0_i32_1 = arith.constant 0 : i32
    return %c0_i32, %c0_i32_0 : i32, i32
  }
  func.func @transform_4(%arg0: i32) -> (i32, i32) {
    %c0_i32 = arith.constant 0 : i32
    %c0_i32_0 = arith.constant 0 : i32
    %c0_i32_1 = arith.constant 0 : i32
    return %c0_i32, %c0_i32_0 : i32, i32
  }
  func.func @transform_5(%arg0: i32) -> (i32, i32) {
    %c0_i32 = arith.constant 0 : i32
    %c0_i32_0 = arith.constant 0 : i32
    return %arg0, %c0_i32 : i32, i32
  }
}

</mosaic_0001>

<bundles_post_ra>
// kernel: simple_nn_forward.1
= control target key start
LH: loop header
LB: loop body
LE: loop exit
PB: predicated region body
PF: predicated region fallthrough
CT: control target
= control target key end

     0   :  { %10 = vsyncpa [#allocation3], 0  ;;  %s560_s0 = inlined_call_operand.hbm [shape: f32[8,32], index: 0, kind: input, shape index: {}]   ;;  %s561_s1 = inlined_call_operand.hbm [shape: f32[32,128], index: 1, kind: input, shape index: {}]   ;;  %s562_s2 = inlined_call_operand.vmem [shape: f32[1,128], index: 2, kind: input, shape index: {}]   ;;  %s563_s3 = inlined_call_operand.hbm [shape: f32[128,128], index: 3, kind: input, shape index: {}]   ;;  %s564_s4 = inlined_call_operand.vmem [shape: f32[1,128], index: 4, kind: input, shape index: {}]   ;;  %s565_s5 = inlined_call_operand.hbm [shape: f32[8,128], index: 5, kind: output, shape index: {}]  }
   0x1   :  { %11 = vsyncpa [#allocation6], 0 }
   0x2   :  { %12 = vsyncpa [#allocation4], 0  ;;  %s461_s18 = smov [#allocation5]   ;;  %s367_s22 = scalar_lea.hbm %s561_s1, 512 }
   0x3   :  { %s28_s19 = sshll.u32 %s461_s18, 4  ;;  %p368_p0 = scmp.ne.s32.totalorder %s561_s1, %s367_s22  ;;  %s29_s19 = int_to_ptr.vmem [resolvable:$true] %s28_s19 }
   0x4   :  { %p371_p1 = scmp.lt.u32.totalorder %s367_s22, %s561_s1 }
   0x6   :  { %p373_p2 = pnand %p371_p1, %p368_p0 }
   0x8   :  { %376 = shalt.err (!%p373_p2)
}
   0x9   :  { %s377_s27 = scalar_lea.vmem %s29_s19, 512  ;;  %p382_p4 = scmp.lt.s32.totalorder %s29_s19, %s29_s19 }
   0xa   :  { %p378_p3 = scmp.ne.s32.totalorder %s29_s19, %s377_s27  ;;  %p383_p5 = scmp.lt.s32.totalorder %s377_s27, %s377_s27 }
   0xc   :  { %p384_p6 = por %p383_p5, %p382_p4 }
   0xe   :  { %p385_p7 = pnand %p384_p6, %p378_p3 }
  0x10   :  { %388 = shalt.err (!%p385_p7)
}
  0x11   :  { %s462_s28 = smov 128   ;;  %s463_s29 = smov 8  }
  0x12   :  { %34 = dma.hbm_to_vmem [thread:$0]  %s561_s1, 512, %s29_s19, [#allocation6], %s462_s28, %s462_s28, %s463_s29  }
  0x13   :  { %s464_s7 = smov [#allocation2]   ;;  %s465_s9 = smov [#allocation7]  }
  0x14   :  { %s19_s8 = sshll.u32 %s464_s7, 4  ;;  %s42_s10 = sshll.u32 %s465_s9, 4  ;;  %s20_s8 = int_to_ptr.vmem [resolvable:$true] %s19_s8  ;;  %s43_s10 = int_to_ptr.vmem [resolvable:$true] %s42_s10 }
  0x15   :  { %s389_s13 = scalar_lea.hbm %s560_s0, 128 }
  0x16   :  { %p390_p8 = scmp.ne.s32.totalorder %s560_s0, %s389_s13  ;;  %p393_p9 = scmp.lt.u32.totalorder %s389_s13, %s560_s0 }
  0x18   :  { %p395_p10 = pnand %p393_p9, %p390_p8 }
  0x1a   :  { %398 = shalt.err (!%p395_p10)
}
  0x1b   :  { %s399_s1 = scalar_lea.vmem %s20_s8, 128  ;;  %p404_p12 = scmp.lt.s32.totalorder %s20_s8, %s20_s8 }
  0x1c   :  { %p400_p11 = scmp.ne.s32.totalorder %s20_s8, %s399_s1  ;;  %p405_p13 = scmp.lt.s32.totalorder %s399_s1, %s399_s1 }
  0x1e   :  { %p406_p0 = por %p405_p13, %p404_p12 }
  0x20   :  { %p407_p1 = pnand %p406_p0, %p400_p11 }
  0x22   :  { %410 = shalt.err (!%p407_p1)
}
  0x23   :  { %22 = dma.hbm_to_vmem [thread:$0]  %s560_s0, 128, %s20_s8, [#allocation3]  }
  0x24   :  { %s411_s22 = scalar_lea.hbm %s563_s3, 2048 }
  0x25   :  { %p412_p2 = scmp.ne.s32.totalorder %s563_s3, %s411_s22  ;;  %p415_p3 = scmp.lt.u32.totalorder %s411_s22, %s563_s3 }
  0x27   :  { %p417_p4 = pnand %p415_p3, %p412_p2 }
  0x29   :  { %420 = shalt.err (!%p417_p4)
}
  0x2a   :  { %s421_s27 = scalar_lea.vmem %s43_s10, 2048  ;;  %p426_p6 = scmp.lt.s32.totalorder %s43_s10, %s43_s10 }
  0x2b   :  { %p422_p5 = scmp.ne.s32.totalorder %s43_s10, %s421_s27  ;;  %p427_p7 = scmp.lt.s32.totalorder %s421_s27, %s421_s27 }
  0x2d   :  { %p428_p8 = por %p427_p7, %p426_p6 }
  0x2f   :  { %p429_p9 = pnand %p428_p8, %p422_p5 }
  0x31   :  { %432 = shalt.err (!%p429_p9)
}
  0x32   :  { %48 = dma.hbm_to_vmem [thread:$0]  %s563_s3, 2048, %s43_s10, [#allocation6], %s462_s28, %s462_s28, %s463_s29  }
  0x33   :  { %455 = dma.done.wait [#allocation3], 128  }
  0x34   :  { %456 = vsyncadd [#allocation3], 4294967168 }
  0x35   :  { %457 = dma.done.wait [#allocation6], 2560  }
  0x36   :  { %458 = vsyncadd [#allocation6], 4294964736  ;;  %v466_v0 = vmov 0.0|0.0   ;;  %vm467_vm0 = vmmov 0   ;;  %v468_v1 = vmov 0.0   ;;  %v61_v2 = vld [vmem:[#allocation5] sm:$0xff] }
  0x37   :  { %328 = vmatprep.subr.bf16.mxu0 %v466_v0  ;;  %290 = vmatprep.mubr.msk.f32.mxu0 %vm467_vm0, %v468_v1  ;;  %v62_v3 = vld [vmem:[#allocation5 + $0x8] sm:$0xff]  ;;  %v63_v4 = vld [vmem:[#allocation5 + $0x10] sm:$0xff]  ;;  %v64_v6 = vld [vmem:[#allocation5 + $0x18] sm:$0xff]  ;;  %vm72_vm1 = vcmask 261120   ;;  %s469_s7 = smov [#allocation8]  }
  0x38   :  { %334 = vmatprep.subr.bf16.mxu1 %v466_v0  ;;  %325 = vmatprep.mubr.msk.f32.mxu1 %vm467_vm0, %v468_v1  ;;  %v329_v5 = vpack.c.bf16 %v62_v3, %v61_v2  ;;  %v147_v7 = vld [vmem:[#allocation7] sm:$0xff]  ;;  %v148_v8 = vld [vmem:[#allocation7 + $0x8] sm:$0xff]  ;;  %v149_v9 = vld [vmem:[#allocation7 + $0x10] sm:$0xff]  ;;  %v332_v11 = vpack.c.bf16 %v64_v6, %v63_v4  ;;  %s247_s8 = sshll.u32 %s469_s7, 4  ;;  %s248_s8 = int_to_ptr.vmem [resolvable:$true] %s247_s8 }
  0x39   :  { %v150_v10 = vld [vmem:[#allocation7 + $0x18] sm:$0xff]  ;;  %v335_v12 = vpack.c.bf16 %v148_v8, %v147_v7  ;;  %v151_v14 = vld [vmem:[#allocation7 + $0x20] sm:$0xff]  ;;  %v152_v15 = vld [vmem:[#allocation7 + $0x28] sm:$0xff]  ;;  %s433_s9 = scalar_lea.vmem %s248_s8, 128  ;;  %p438_p11 = scmp.lt.s32.totalorder %s248_s8, %s248_s8 }
  0x3a   :  { %330 = vmatpush3.bf16.msra.mxu0 %v329_v5  ;;  %v338_v13 = vpack.c.bf16 %v150_v10, %v149_v9  ;;  %v60_v16 = vld [vmem:[#allocation2] sm:$0xff]  ;;  %v341_v17 = vpack.c.bf16 %v152_v15, %v151_v14  ;;  %v153_v18 = vld [vmem:[#allocation7 + $0x30] sm:$0xff]  ;;  %v155_v21 = vld [vmem:[#allocation7 + $0x40] sm:$0xff]  ;;  %p434_p10 = scmp.ne.s32.totalorder %s248_s8, %s433_s9  ;;  %p439_p12 = scmp.lt.s32.totalorder %s433_s9, %s433_s9 }
  0x3b   :  { %331 = vmatprep.subr.bf16.mxu0 %v466_v0  ;;  %336 = vmatpush3.bf16.msra.mxu1 %v335_v12  ;;  %v154_v19 = vld [vmem:[#allocation7 + $0x38] sm:$0xff]  ;;  %v156_v22 = vld [vmem:[#allocation7 + $0x48] sm:$0xff]  ;;  %v157_v24 = vld [vmem:[#allocation7 + $0x50] sm:$0xff] }
  0x3c   :  { %337 = vmatprep.subr.bf16.mxu1 %v466_v0  ;;  %v344_v20 = vpack.c.bf16 %v154_v19, %v153_v18  ;;  %v347_v23 = vpack.c.bf16 %v156_v22, %v155_v21  ;;  %v158_v25 = vld [vmem:[#allocation7 + $0x58] sm:$0xff]  ;;  %v159_v27 = vld [vmem:[#allocation7 + $0x60] sm:$0xff]  ;;  %v160_v28 = vld [vmem:[#allocation7 + $0x68] sm:$0xff]  ;;  %p440_p13 = por %p439_p12, %p438_p11 }
  0x3d   :  { %v350_v26 = vpack.c.bf16 %v158_v25, %v157_v24  ;;  %v353_v29 = vpack.c.bf16 %v160_v28, %v159_v27  ;;  %v161_v30 = vld [vmem:[#allocation7 + $0x70] sm:$0xff]  ;;  %v162_v31 = vld [vmem:[#allocation7 + $0x78] sm:$0xff] }
  0x3e   :  { %333 = vmatpush3.bf16.msra.mxu0 %v332_v11  ;;  %v356_v32 = vpack.c.bf16 %v162_v31, %v161_v30  ;;  %v257_v33 = vld [vmem:[%s562_s2] ss:$0 sm:$0xff]  ;;  %p441_p0 = pnand %p440_p13, %p434_p10 }
  0x3f   :  { %339 = vmatpush3.bf16.msra.mxu1 %v338_v13  ;;  %v259_v38 = vld [vmem:[%s564_s4] ss:$0 sm:$0xff] }
  0x40   :  { %340 = vmatprep.subr.bf16.mxu1 %v466_v0 }
  0x41   :  { %291 = vmatmul.mubr.msk.f32.vlgmr.msra.gmra.mrb[0].mxu0 %vm72_vm1, %v60_v16 }
  0x43   :  { %342 = vmatpush3.bf16.msra.mxu1 %v341_v17 }
  0x44   :  { %343 = vmatprep.subr.bf16.mxu1 %v466_v0 }
  0x47   :  { %345 = vmatpush3.bf16.msra.mxu1 %v344_v20 }
  0x48   :  { %346 = vmatprep.subr.bf16.mxu1 %v466_v0 }
  0x4b   :  { %348 = vmatpush3.bf16.msra.mxu1 %v347_v23 }
  0x4c   :  { %349 = vmatprep.subr.bf16.mxu1 %v466_v0 }
  0x4f   :  { %351 = vmatpush3.bf16.msra.mxu1 %v350_v26 }
  0x50   :  { %352 = vmatprep.subr.bf16.mxu1 %v466_v0 }
  0x53   :  { %354 = vmatpush3.bf16.msra.mxu1 %v353_v29 }
  0x54   :  { %355 = vmatprep.subr.bf16.mxu1 %v466_v0 }
  0x57   :  { %357 = vmatpush3.bf16.msra.mxu1 %v356_v32 }
 0x114   :  { %v142_v34 = vpop.f32.mrb[0].mxu0 }
 0x115   :  { %v143_v35 = vadd.f32 %v257_v33, %v142_v34  ;;  %v292_v36 = vpop.f32.mrb[1].mxu0 }
 0x117   :  { %v146_v37 = vmax.f32 %v143_v35, 0.0 }
 0x119   :  { %326 = vmatmul.mubr.f32.vlgmr.msra.gmra.mrb[0].mxu1 %v146_v37 }
 0x1ec   :  { %v236_v39 = vpop.f32.mrb[0].mxu1 }
 0x1ed   :  { %v237_v40 = vadd.f32 %v259_v38, %v236_v39  ;;  %v327_v41 = vpop.f32.mrb[1].mxu1 }
 0x1ef   :  { %240 = vst [vmem:[#allocation8] sm:$0xff] %v237_v40 }
 0x1f0   :  { %444 = shalt.err (!%p441_p0)
}
 0x1f1   :  { %s445_s11 = scalar_lea.hbm %s565_s5, 128 }
 0x1f2   :  { %p446_p1 = scmp.ne.s32.totalorder %s565_s5, %s445_s11  ;;  %p449_p2 = scmp.lt.u32.totalorder %s445_s11, %s565_s5 }
 0x1f4   :  { %p451_p3 = pnand %p449_p2, %p446_p1 }
 0x1f6   :  { %454 = shalt.err (!%p451_p3)
}
 0x1f7   :  { %250 = dma.vmem_to_hbm [thread:$0]  %s248_s8, 128, %s565_s5, [#allocation4]  }
 0x1f8   :  { %459 = dma.done.wait [#allocation4], 128  }
 0x1f9   :  { %460 = vsyncadd [#allocation4], 4294967168 }
 0x1fa   :  { %254 = vsyncpa [#allocation3], 1 }
 0x1fb   :  { %255 = vsyncpa [#allocation6], 1 }
 0x1fc   :  { %256 = vsyncpa [#allocation4], 1 }

</bundles_post_ra>
